<compile_context>
chip_gen: v7x
topology: tpu7x:2x2x1
jax: 0.10.0
libtpu: 0.0.40
codegen_flags: <defaults>
</compile_context>

<pallas_src>
import jax
import jax.numpy as jnp
from jax.experimental import pallas as pl
from jax.experimental.pallas import tpu as pltpu


def _round_up(n, m):
    return ((n + m - 1) // m) * m


def mlp_kernel(p_ref, x_ref, o_ref):
    # p_ref : (52,) f32 in SMEM, flat parameter vector:
    #           [0:20]  w1 row-major (10,2) -> w1[j,0]=p[2j], w1[j,1]=p[2j+1]
    #           [20:30] b1
    #           [30:50] w2 row-major (2,10) -> w2[0,j]=p[30+j], w2[1,j]=p[40+j]
    #           [50:52] b2
    # x_ref : (8, TBL) sublane-packed input block
    #           rows 0-3 = feature-0 batch quarters, rows 4-7 = feature-1.
    # o_ref : (8, TBL) output block in the same packed layout
    #           rows 0-3 = output-0 quarters, rows 4-7 = output-1 quarters.
    x = x_ref[...]                       # (8, TBL) — one dense load
    x0 = x[0:4, :]                       # (4, TBL) feature 0
    x1 = x[4:8, :]                       # (4, TBL) feature 1

    # fc2 bias as accumulator init (scalar splat from SMEM).
    y0 = jnp.full(x0.shape, p_ref[50], dtype=jnp.float32)
    y1 = jnp.full(x0.shape, p_ref[51], dtype=jnp.float32)

    # Hidden units computed one at a time (only one (4, TBL) temporary live),
    # fused straight into the fc2 accumulation.  Pure scalar-operand VPU MACs.
    for j in range(10):                  # static unroll (K is tiny)
        h = jnp.maximum(
            p_ref[2 * j] * x0 + p_ref[2 * j + 1] * x1 + p_ref[20 + j], 0.0
        )                                # (4, TBL) ReLU(fc1_j)
        # TODO(synk): training-mode dropout would Bernoulli(0.5)-mask `h` here
        # via pltpu.prng_seed(seed ^ pl.program_id(0)) + pltpu.prng_random_bits
        # and scale by 2.0; eval-mode nn.Dropout is the identity (matched here).
        y0 = y0 + p_ref[30 + j] * h      # fc2 row 0
        y1 = y1 + p_ref[40 + j] * h      # fc2 row 1

    # Single fully dense (8, TBL) store (lane- and sublane-dense vst).
    o_ref[...] = jnp.concatenate([y0, y1], axis=0)


def mlp_forward(x, w1, b1, w2, b2, *, max_lane_tile=32768):
    """x: (B, 2) f32. w1: (10, 2), b1: (10,), w2: (2, 10), b2: (2,) (torch layout)."""
    B = x.shape[0]

    # Merge all parameters into one flat f32 vector (resident in SMEM).
    params = jnp.concatenate([
        w1.astype(jnp.float32).reshape(-1),   # 20
        b1.astype(jnp.float32).reshape(-1),   # 10
        w2.astype(jnp.float32).reshape(-1),   # 20
        b2.astype(jnp.float32).reshape(-1),   # 2
    ])                                        # (52,)

    # Pad the batch only to the packing granularity (4 quarters x 128 lanes),
    # NOT to a full tile; the last grid block may be ragged (Pallas masks it).
    Bp = _round_up(max(B, 1), 512)
    xp = x.astype(jnp.float32)
    if Bp != B:
        xp = jnp.pad(xp, ((0, Bp - B), (0, 0)))      # single fused pad

    # Sublane-packed, feature-major slab: (8, L), L = Bp/4.
    # One transpose copy at the model boundary; the reshape is free.
    L = Bp // 4
    x_slab = xp.T.reshape(8, L)

    # Lane tile: as large as possible (amortizes ~0.35 us/step), but capped so
    # the grid has >= 2 steps to feed both TensorCores on v7x when B is large.
    TBL = min(max_lane_tile, _round_up(pl.cdiv(L, 2), 128))
    TBL = max(TBL, 128)
    grid = (pl.cdiv(L, TBL),)

    out_slab = pl.pallas_call(
        mlp_kernel,
        out_shape=jax.ShapeDtypeStruct((8, L), jnp.float32),
        grid=grid,
        in_specs=[
            pl.BlockSpec(memory_space=pltpu.MemorySpace.SMEM),   # params (52,)
            pl.BlockSpec((8, TBL), lambda i: (0, i)),            # packed x tile
        ],
        out_specs=pl.BlockSpec((8, TBL), lambda i: (0, i)),
        compiler_params=pltpu.CompilerParams(
            dimension_semantics=("parallel",),     # shard batch tiles across TCs
            vmem_limit_bytes=32 * 1024 * 1024,     # headroom for big tiles, safe on all gens
        ),
    )(params, x_slab)

    # Unpack: (8, L) -> (2, Bp) -> (B, 2), dropping batch padding.
    return out_slab.reshape(2, Bp)[:, :B].T


def init_params(key):
    # Deterministic init mimicking torch.nn.Linear default:
    # U(-1/sqrt(fan_in), 1/sqrt(fan_in)) for both weight and bias, (out, in) layout.
    k1, k2, k3, k4 = jax.random.split(key, 4)
    bound1 = 1.0 / jnp.sqrt(2.0)
    bound2 = 1.0 / jnp.sqrt(10.0)
    w1 = jax.random.uniform(k1, (10, 2), jnp.float32, -bound1, bound1)
    b1 = jax.random.uniform(k2, (10,), jnp.float32, -bound1, bound1)
    w2 = jax.random.uniform(k3, (2, 10), jnp.float32, -bound2, bound2)
    b2 = jax.random.uniform(k4, (2,), jnp.float32, -bound2, bound2)
    return w1, b1, w2, b2


def _reference(x, w1, b1, w2, b2):
    # Plain-JAX reference (eval-mode dropout == identity), torch-layout weights.
    return jnp.maximum(x @ w1.T + b1, 0.0) @ w2.T + b2


if __name__ == "__main__":
    key = jax.random.PRNGKey(0)
    k_params, k_x1, k_x2 = jax.random.split(key, 3)
    w1, b1, w2, b2 = init_params(k_params)

    # Small demo batch.
    B = 8
    x = jax.random.normal(k_x1, (B, 2), jnp.float32)
    out = jax.block_until_ready(mlp_forward(x, w1, b1, w2, b2))
    ref = _reference(x, w1, b1, w2, b2)
    assert out.shape == (B, 2)
    assert jnp.allclose(out, ref, atol=1e-4, rtol=1e-5)

    # Second check exercising the multi-tile + ragged-last-block path
    # (forces >1 grid step via a small max_lane_tile).
    B2 = 1500
    x2 = jax.random.normal(k_x2, (B2, 2), jnp.float32)
    out2 = jax.block_until_ready(
        mlp_forward(x2, w1, b1, w2, b2, max_lane_tile=256)
    )
    ref2 = _reference(x2, w1, b1, w2, b2)
    assert out2.shape == (B2, 2)
    assert jnp.allclose(out2, ref2, atol=1e-4, rtol=1e-5)

    print("KERNEL_OK")
</pallas_src>

<mosaic_0001>
module attributes {stable_mosaic.version = 11 : i64} {
  func.func @mlp_kernel(%arg0: i32, %arg1: memref<52xf32, #tpu.memory_space<smem>>, %arg2: memref<8x128xf32, #tpu.memory_space<vmem>>, %arg3: memref<8x128xf32, #tpu.memory_space<vmem>>) attributes {dimension_semantics = [#tpu.dimension_semantics<parallel>], iteration_bounds = array<i64: 1>, scalar_prefetch = 0 : i64, scratch_operands = 0 : i64, tpu.core_type = #tpu.core_type<tc>, window_params = [{transform_indices = @transform_0, window_bounds = array<i64: 52>}, {transform_indices = @transform_1, window_bounds = array<i64: 8, 128>}, {transform_indices = @transform_2, window_bounds = array<i64: 8, 128>}]} {
    %c0 = arith.constant 0 : index
    %c0_0 = arith.constant 0 : index
    %0 = vector.load %arg2[%c0, %c0_0] : memref<8x128xf32, #tpu.memory_space<vmem>>, vector<8x128xf32>
    %1 = vector.extract_strided_slice %0 {offsets = [0, 0], sizes = [4, 128], strides = [1, 1]} : vector<8x128xf32> to vector<4x128xf32>
    %2 = vector.extract_strided_slice %0 {offsets = [4, 0], sizes = [4, 128], strides = [1, 1]} : vector<8x128xf32> to vector<4x128xf32>
    %c50 = arith.constant 50 : index
    %3 = memref.load %arg1[%c50] : memref<52xf32, #tpu.memory_space<smem>>
    %4 = vector.broadcast %3 : f32 to vector<4x128xf32>
    %c51 = arith.constant 51 : index
    %5 = memref.load %arg1[%c51] : memref<52xf32, #tpu.memory_space<smem>>
    %6 = vector.broadcast %5 : f32 to vector<4x128xf32>
    %c0_1 = arith.constant 0 : index
    %7 = memref.load %arg1[%c0_1] : memref<52xf32, #tpu.memory_space<smem>>
    %8 = vector.broadcast %7 : f32 to vector<4x128xf32>
    %9 = arith.mulf %8, %1 : vector<4x128xf32>
    %c1 = arith.constant 1 : index
    %10 = memref.load %arg1[%c1] : memref<52xf32, #tpu.memory_space<smem>>
    %11 = vector.broadcast %10 : f32 to vector<4x128xf32>
    %12 = arith.mulf %11, %2 : vector<4x128xf32>
    %13 = arith.addf %9, %12 : vector<4x128xf32>
    %c20 = arith.constant 20 : index
    %14 = memref.load %arg1[%c20] : memref<52xf32, #tpu.memory_space<smem>>
    %15 = vector.broadcast %14 : f32 to vector<4x128xf32>
    %16 = arith.addf %13, %15 : vector<4x128xf32>
    %cst = arith.constant 0.000000e+00 : f32
    %17 = vector.broadcast %cst : f32 to vector<4x128xf32>
    %18 = arith.maximumf %16, %17 : vector<4x128xf32>
    %c30 = arith.constant 30 : index
    %19 = memref.load %arg1[%c30] : memref<52xf32, #tpu.memory_space<smem>>
    %20 = vector.broadcast %19 : f32 to vector<4x128xf32>
    %21 = arith.mulf %20, %18 : vector<4x128xf32>
    %22 = arith.addf %4, %21 : vector<4x128xf32>
    %c40 = arith.constant 40 : index
    %23 = memref.load %arg1[%c40] : memref<52xf32, #tpu.memory_space<smem>>
    %24 = vector.broadcast %23 : f32 to vector<4x128xf32>
    %25 = arith.mulf %24, %18 : vector<4x128xf32>
    %26 = arith.addf %6, %25 : vector<4x128xf32>
    %c2 = arith.constant 2 : index
    %27 = memref.load %arg1[%c2] : memref<52xf32, #tpu.memory_space<smem>>
    %28 = vector.broadcast %27 : f32 to vector<4x128xf32>
    %29 = arith.mulf %28, %1 : vector<4x128xf32>
    %c3 = arith.constant 3 : index
    %30 = memref.load %arg1[%c3] : memref<52xf32, #tpu.memory_space<smem>>
    %31 = vector.broadcast %30 : f32 to vector<4x128xf32>
    %32 = arith.mulf %31, %2 : vector<4x128xf32>
    %33 = arith.addf %29, %32 : vector<4x128xf32>
    %c21 = arith.constant 21 : index
    %34 = memref.load %arg1[%c21] : memref<52xf32, #tpu.memory_space<smem>>
    %35 = vector.broadcast %34 : f32 to vector<4x128xf32>
    %36 = arith.addf %33, %35 : vector<4x128xf32>
    %cst_2 = arith.constant 0.000000e+00 : f32
    %37 = vector.broadcast %cst_2 : f32 to vector<4x128xf32>
    %38 = arith.maximumf %36, %37 : vector<4x128xf32>
    %c31 = arith.constant 31 : index
    %39 = memref.load %arg1[%c31] : memref<52xf32, #tpu.memory_space<smem>>
    %40 = vector.broadcast %39 : f32 to vector<4x128xf32>
    %41 = arith.mulf %40, %38 : vector<4x128xf32>
    %42 = arith.addf %22, %41 : vector<4x128xf32>
    %c41 = arith.constant 41 : index
    %43 = memref.load %arg1[%c41] : memref<52xf32, #tpu.memory_space<smem>>
    %44 = vector.broadcast %43 : f32 to vector<4x128xf32>
    %45 = arith.mulf %44, %38 : vector<4x128xf32>
    %46 = arith.addf %26, %45 : vector<4x128xf32>
    %c4 = arith.constant 4 : index
    %47 = memref.load %arg1[%c4] : memref<52xf32, #tpu.memory_space<smem>>
    %48 = vector.broadcast %47 : f32 to vector<4x128xf32>
    %49 = arith.mulf %48, %1 : vector<4x128xf32>
    %c5 = arith.constant 5 : index
    %50 = memref.load %arg1[%c5] : memref<52xf32, #tpu.memory_space<smem>>
    %51 = vector.broadcast %50 : f32 to vector<4x128xf32>
    %52 = arith.mulf %51, %2 : vector<4x128xf32>
    %53 = arith.addf %49, %52 : vector<4x128xf32>
    %c22 = arith.constant 22 : index
    %54 = memref.load %arg1[%c22] : memref<52xf32, #tpu.memory_space<smem>>
    %55 = vector.broadcast %54 : f32 to vector<4x128xf32>
    %56 = arith.addf %53, %55 : vector<4x128xf32>
    %cst_3 = arith.constant 0.000000e+00 : f32
    %57 = vector.broadcast %cst_3 : f32 to vector<4x128xf32>
    %58 = arith.maximumf %56, %57 : vector<4x128xf32>
    %c32 = arith.constant 32 : index
    %59 = memref.load %arg1[%c32] : memref<52xf32, #tpu.memory_space<smem>>
    %60 = vector.broadcast %59 : f32 to vector<4x128xf32>
    %61 = arith.mulf %60, %58 : vector<4x128xf32>
    %62 = arith.addf %42, %61 : vector<4x128xf32>
    %c42 = arith.constant 42 : index
    %63 = memref.load %arg1[%c42] : memref<52xf32, #tpu.memory_space<smem>>
    %64 = vector.broadcast %63 : f32 to vector<4x128xf32>
    %65 = arith.mulf %64, %58 : vector<4x128xf32>
    %66 = arith.addf %46, %65 : vector<4x128xf32>
    %c6 = arith.constant 6 : index
    %67 = memref.load %arg1[%c6] : memref<52xf32, #tpu.memory_space<smem>>
    %68 = vector.broadcast %67 : f32 to vector<4x128xf32>
    %69 = arith.mulf %68, %1 : vector<4x128xf32>
    %c7 = arith.constant 7 : index
    %70 = memref.load %arg1[%c7] : memref<52xf32, #tpu.memory_space<smem>>
    %71 = vector.broadcast %70 : f32 to vector<4x128xf32>
    %72 = arith.mulf %71, %2 : vector<4x128xf32>
    %73 = arith.addf %69, %72 : vector<4x128xf32>
    %c23 = arith.constant 23 : index
    %74 = memref.load %arg1[%c23] : memref<52xf32, #tpu.memory_space<smem>>
    %75 = vector.broadcast %74 : f32 to vector<4x128xf32>
    %76 = arith.addf %73, %75 : vector<4x128xf32>
    %cst_4 = arith.constant 0.000000e+00 : f32
    %77 = vector.broadcast %cst_4 : f32 to vector<4x128xf32>
    %78 = arith.maximumf %76, %77 : vector<4x128xf32>
    %c33 = arith.constant 33 : index
    %79 = memref.load %arg1[%c33] : memref<52xf32, #tpu.memory_space<smem>>
    %80 = vector.broadcast %79 : f32 to vector<4x128xf32>
    %81 = arith.mulf %80, %78 : vector<4x128xf32>
    %82 = arith.addf %62, %81 : vector<4x128xf32>
    %c43 = arith.constant 43 : index
    %83 = memref.load %arg1[%c43] : memref<52xf32, #tpu.memory_space<smem>>
    %84 = vector.broadcast %83 : f32 to vector<4x128xf32>
    %85 = arith.mulf %84, %78 : vector<4x128xf32>
    %86 = arith.addf %66, %85 : vector<4x128xf32>
    %c8 = arith.constant 8 : index
    %87 = memref.load %arg1[%c8] : memref<52xf32, #tpu.memory_space<smem>>
    %88 = vector.broadcast %87 : f32 to vector<4x128xf32>
    %89 = arith.mulf %88, %1 : vector<4x128xf32>
    %c9 = arith.constant 9 : index
    %90 = memref.load %arg1[%c9] : memref<52xf32, #tpu.memory_space<smem>>
    %91 = vector.broadcast %90 : f32 to vector<4x128xf32>
    %92 = arith.mulf %91, %2 : vector<4x128xf32>
    %93 = arith.addf %89, %92 : vector<4x128xf32>
    %c24 = arith.constant 24 : index
    %94 = memref.load %arg1[%c24] : memref<52xf32, #tpu.memory_space<smem>>
    %95 = vector.broadcast %94 : f32 to vector<4x128xf32>
    %96 = arith.addf %93, %95 : vector<4x128xf32>
    %cst_5 = arith.constant 0.000000e+00 : f32
    %97 = vector.broadcast %cst_5 : f32 to vector<4x128xf32>
    %98 = arith.maximumf %96, %97 : vector<4x128xf32>
    %c34 = arith.constant 34 : index
    %99 = memref.load %arg1[%c34] : memref<52xf32, #tpu.memory_space<smem>>
    %100 = vector.broadcast %99 : f32 to vector<4x128xf32>
    %101 = arith.mulf %100, %98 : vector<4x128xf32>
    %102 = arith.addf %82, %101 : vector<4x128xf32>
    %c44 = arith.constant 44 : index
    %103 = memref.load %arg1[%c44] : memref<52xf32, #tpu.memory_space<smem>>
    %104 = vector.broadcast %103 : f32 to vector<4x128xf32>
    %105 = arith.mulf %104, %98 : vector<4x128xf32>
    %106 = arith.addf %86, %105 : vector<4x128xf32>
    %c10 = arith.constant 10 : index
    %107 = memref.load %arg1[%c10] : memref<52xf32, #tpu.memory_space<smem>>
    %108 = vector.broadcast %107 : f32 to vector<4x128xf32>
    %109 = arith.mulf %108, %1 : vector<4x128xf32>
    %c11 = arith.constant 11 : index
    %110 = memref.load %arg1[%c11] : memref<52xf32, #tpu.memory_space<smem>>
    %111 = vector.broadcast %110 : f32 to vector<4x128xf32>
    %112 = arith.mulf %111, %2 : vector<4x128xf32>
    %113 = arith.addf %109, %112 : vector<4x128xf32>
    %c25 = arith.constant 25 : index
    %114 = memref.load %arg1[%c25] : memref<52xf32, #tpu.memory_space<smem>>
    %115 = vector.broadcast %114 : f32 to vector<4x128xf32>
    %116 = arith.addf %113, %115 : vector<4x128xf32>
    %cst_6 = arith.constant 0.000000e+00 : f32
    %117 = vector.broadcast %cst_6 : f32 to vector<4x128xf32>
    %118 = arith.maximumf %116, %117 : vector<4x128xf32>
    %c35 = arith.constant 35 : index
    %119 = memref.load %arg1[%c35] : memref<52xf32, #tpu.memory_space<smem>>
    %120 = vector.broadcast %119 : f32 to vector<4x128xf32>
    %121 = arith.mulf %120, %118 : vector<4x128xf32>
    %122 = arith.addf %102, %121 : vector<4x128xf32>
    %c45 = arith.constant 45 : index
    %123 = memref.load %arg1[%c45] : memref<52xf32, #tpu.memory_space<smem>>
    %124 = vector.broadcast %123 : f32 to vector<4x128xf32>
    %125 = arith.mulf %124, %118 : vector<4x128xf32>
    %126 = arith.addf %106, %125 : vector<4x128xf32>
    %c12 = arith.constant 12 : index
    %127 = memref.load %arg1[%c12] : memref<52xf32, #tpu.memory_space<smem>>
    %128 = vector.broadcast %127 : f32 to vector<4x128xf32>
    %129 = arith.mulf %128, %1 : vector<4x128xf32>
    %c13 = arith.constant 13 : index
    %130 = memref.load %arg1[%c13] : memref<52xf32, #tpu.memory_space<smem>>
    %131 = vector.broadcast %130 : f32 to vector<4x128xf32>
    %132 = arith.mulf %131, %2 : vector<4x128xf32>
    %133 = arith.addf %129, %132 : vector<4x128xf32>
    %c26 = arith.constant 26 : index
    %134 = memref.load %arg1[%c26] : memref<52xf32, #tpu.memory_space<smem>>
    %135 = vector.broadcast %134 : f32 to vector<4x128xf32>
    %136 = arith.addf %133, %135 : vector<4x128xf32>
    %cst_7 = arith.constant 0.000000e+00 : f32
    %137 = vector.broadcast %cst_7 : f32 to vector<4x128xf32>
    %138 = arith.maximumf %136, %137 : vector<4x128xf32>
    %c36 = arith.constant 36 : index
    %139 = memref.load %arg1[%c36] : memref<52xf32, #tpu.memory_space<smem>>
    %140 = vector.broadcast %139 : f32 to vector<4x128xf32>
    %141 = arith.mulf %140, %138 : vector<4x128xf32>
    %142 = arith.addf %122, %141 : vector<4x128xf32>
    %c46 = arith.constant 46 : index
    %143 = memref.load %arg1[%c46] : memref<52xf32, #tpu.memory_space<smem>>
    %144 = vector.broadcast %143 : f32 to vector<4x128xf32>
    %145 = arith.mulf %144, %138 : vector<4x128xf32>
    %146 = arith.addf %126, %145 : vector<4x128xf32>
    %c14 = arith.constant 14 : index
    %147 = memref.load %arg1[%c14] : memref<52xf32, #tpu.memory_space<smem>>
    %148 = vector.broadcast %147 : f32 to vector<4x128xf32>
    %149 = arith.mulf %148, %1 : vector<4x128xf32>
    %c15 = arith.constant 15 : index
    %150 = memref.load %arg1[%c15] : memref<52xf32, #tpu.memory_space<smem>>
    %151 = vector.broadcast %150 : f32 to vector<4x128xf32>
    %152 = arith.mulf %151, %2 : vector<4x128xf32>
    %153 = arith.addf %149, %152 : vector<4x128xf32>
    %c27 = arith.constant 27 : index
    %154 = memref.load %arg1[%c27] : memref<52xf32, #tpu.memory_space<smem>>
    %155 = vector.broadcast %154 : f32 to vector<4x128xf32>
    %156 = arith.addf %153, %155 : vector<4x128xf32>
    %cst_8 = arith.constant 0.000000e+00 : f32
    %157 = vector.broadcast %cst_8 : f32 to vector<4x128xf32>
    %158 = arith.maximumf %156, %157 : vector<4x128xf32>
    %c37 = arith.constant 37 : index
    %159 = memref.load %arg1[%c37] : memref<52xf32, #tpu.memory_space<smem>>
    %160 = vector.broadcast %159 : f32 to vector<4x128xf32>
    %161 = arith.mulf %160, %158 : vector<4x128xf32>
    %162 = arith.addf %142, %161 : vector<4x128xf32>
    %c47 = arith.constant 47 : index
    %163 = memref.load %arg1[%c47] : memref<52xf32, #tpu.memory_space<smem>>
    %164 = vector.broadcast %163 : f32 to vector<4x128xf32>
    %165 = arith.mulf %164, %158 : vector<4x128xf32>
    %166 = arith.addf %146, %165 : vector<4x128xf32>
    %c16 = arith.constant 16 : index
    %167 = memref.load %arg1[%c16] : memref<52xf32, #tpu.memory_space<smem>>
    %168 = vector.broadcast %167 : f32 to vector<4x128xf32>
    %169 = arith.mulf %168, %1 : vector<4x128xf32>
    %c17 = arith.constant 17 : index
    %170 = memref.load %arg1[%c17] : memref<52xf32, #tpu.memory_space<smem>>
    %171 = vector.broadcast %170 : f32 to vector<4x128xf32>
    %172 = arith.mulf %171, %2 : vector<4x128xf32>
    %173 = arith.addf %169, %172 : vector<4x128xf32>
    %c28 = arith.constant 28 : index
    %174 = memref.load %arg1[%c28] : memref<52xf32, #tpu.memory_space<smem>>
    %175 = vector.broadcast %174 : f32 to vector<4x128xf32>
    %176 = arith.addf %173, %175 : vector<4x128xf32>
    %cst_9 = arith.constant 0.000000e+00 : f32
    %177 = vector.broadcast %cst_9 : f32 to vector<4x128xf32>
    %178 = arith.maximumf %176, %177 : vector<4x128xf32>
    %c38 = arith.constant 38 : index
    %179 = memref.load %arg1[%c38] : memref<52xf32, #tpu.memory_space<smem>>
    %180 = vector.broadcast %179 : f32 to vector<4x128xf32>
    %181 = arith.mulf %180, %178 : vector<4x128xf32>
    %182 = arith.addf %162, %181 : vector<4x128xf32>
    %c48 = arith.constant 48 : index
    %183 = memref.load %arg1[%c48] : memref<52xf32, #tpu.memory_space<smem>>
    %184 = vector.broadcast %183 : f32 to vector<4x128xf32>
    %185 = arith.mulf %184, %178 : vector<4x128xf32>
    %186 = arith.addf %166, %185 : vector<4x128xf32>
    %c18 = arith.constant 18 : index
    %187 = memref.load %arg1[%c18] : memref<52xf32, #tpu.memory_space<smem>>
    %188 = vector.broadcast %187 : f32 to vector<4x128xf32>
    %189 = arith.mulf %188, %1 : vector<4x128xf32>
    %c19 = arith.constant 19 : index
    %190 = memref.load %arg1[%c19] : memref<52xf32, #tpu.memory_space<smem>>
    %191 = vector.broadcast %190 : f32 to vector<4x128xf32>
    %192 = arith.mulf %191, %2 : vector<4x128xf32>
    %193 = arith.addf %189, %192 : vector<4x128xf32>
    %c29 = arith.constant 29 : index
    %194 = memref.load %arg1[%c29] : memref<52xf32, #tpu.memory_space<smem>>
    %195 = vector.broadcast %194 : f32 to vector<4x128xf32>
    %196 = arith.addf %193, %195 : vector<4x128xf32>
    %cst_10 = arith.constant 0.000000e+00 : f32
    %197 = vector.broadcast %cst_10 : f32 to vector<4x128xf32>
    %198 = arith.maximumf %196, %197 : vector<4x128xf32>
    %c39 = arith.constant 39 : index
    %199 = memref.load %arg1[%c39] : memref<52xf32, #tpu.memory_space<smem>>
    %200 = vector.broadcast %199 : f32 to vector<4x128xf32>
    %201 = arith.mulf %200, %198 : vector<4x128xf32>
    %202 = arith.addf %182, %201 : vector<4x128xf32>
    %c49 = arith.constant 49 : index
    %203 = memref.load %arg1[%c49] : memref<52xf32, #tpu.memory_space<smem>>
    %204 = vector.broadcast %203 : f32 to vector<4x128xf32>
    %205 = arith.mulf %204, %198 : vector<4x128xf32>
    %206 = arith.addf %186, %205 : vector<4x128xf32>
    %207 = tpu.concatenate %202, %206 in 0 : vector<4x128xf32>, vector<4x128xf32> -> vector<8x128xf32>
    %c0_11 = arith.constant 0 : index
    %c0_12 = arith.constant 0 : index
    %208 = vector.load %arg3[%c0_11, %c0_12] : memref<8x128xf32, #tpu.memory_space<vmem>>, vector<8x128xf32>
    tpu.vector_store %arg3[%c0_11, %c0_12], %207 {strides = array<i32>} : memref<8x128xf32, #tpu.memory_space<vmem>>, vector<8x128xf32>,
    return
  }
  func.func @transform_0(%arg0: i32) -> i32 {
    %c0_i32 = arith.constant 0 : i32
    %c0_i32_0 = arith.constant 0 : i32
    return %c0_i32 : i32
  }
  func.func @transform_1(%arg0: i32) -> (i32, i32) {
    %c0_i32 = arith.constant 0 : i32
    %c0_i32_0 = arith.constant 0 : i32
    return %c0_i32, %arg0 : i32, i32
  }
  func.func @transform_2(%arg0: i32) -> (i32, i32) {
    %c0_i32 = arith.constant 0 : i32
    %c0_i32_0 = arith.constant 0 : i32
    return %c0_i32, %arg0 : i32, i32
  }
}

</mosaic_0001>

<bundles_post_ra>
// kernel: tpu_custom_call.1
= control target key start
LH: loop header
LB: loop body
LE: loop exit
PB: predicated region body
PF: predicated region fallthrough
CT: control target
= control target key end

     0   :  { %7 = vsyncpa [#allocation5], 0  ;;  %s610_s0 = inlined_call_operand.hbm [shape: f32[52], index: 0, kind: input, shape index: {}]   ;;  %s611_s1 = inlined_call_operand.hbm [shape: f32[8,128], index: 1, kind: input, shape index: {}]   ;;  %s612_s2 = inlined_call_operand.hbm [shape: f32[8,128], index: 2, kind: output, shape index: {}]  }
   0x1   :  { %8 = vsyncpa [#allocation3], 0 }
   0x2   :  { %9 = vsyncpa [#allocation4], 0  ;;  %s336_s11 = scalar_lea.hbm %s610_s0, 16 }
   0x3   :  { %p337_p0 = scmp.ne.s32.totalorder %s610_s0, %s336_s11  ;;  %p340_p1 = scmp.lt.u32.totalorder %s336_s11, %s610_s0 }
   0x5   :  { %p342_p2 = pnand %p340_p1, %p337_p0 }
   0x7   :  { %345 = shalt.err (!%p342_p2)
}
   0x8   :  { %s396_s16 = smov [#allocation2]   ;;  %s397_s19 = smov [#allocation6]  }
   0x9   :  { %17 = dma.hbm_to_smem %s610_s0, 16, %s396_s16, [#allocation5]  }
   0xa   :  { %s24_s20 = sshll.u32 %s397_s19, 4  ;;  %s346_s23 = scalar_lea.hbm %s611_s1, 128  ;;  %s25_s20 = int_to_ptr.vmem [resolvable:$true] %s24_s20 }
   0xb   :  { %p347_p3 = scmp.ne.s32.totalorder %s611_s1, %s346_s23  ;;  %p350_p4 = scmp.lt.u32.totalorder %s346_s23, %s611_s1 }
   0xd   :  { %p352_p5 = pnand %p350_p4, %p347_p3 }
   0xf   :  { %355 = shalt.err (!%p352_p5)
}
  0x10   :  { %s356_s28 = scalar_lea.vmem %s25_s20, 128  ;;  %p361_p7 = scmp.lt.s32.totalorder %s25_s20, %s25_s20 }
  0x11   :  { %p357_p6 = scmp.ne.s32.totalorder %s25_s20, %s356_s28  ;;  %p362_p8 = scmp.lt.s32.totalorder %s356_s28, %s356_s28 }
  0x13   :  { %p363_p9 = por %p362_p8, %p361_p7 }
  0x15   :  { %p364_p10 = pnand %p363_p9, %p357_p6 }
  0x17   :  { %367 = shalt.err (!%p364_p10)
}
  0x18   :  { %27 = dma.hbm_to_vmem [thread:$0]  %s611_s1, 128, %s25_s20, [#allocation3]  }
  0x19   :  { %390 = dma.done.wait [#allocation5], 16  }
  0x1a   :  { %391 = vsyncadd [#allocation5], 4294967280 }
  0x1b   :  { %392 = dma.done.wait [#allocation3], 128  }
  0x1c   :  { %393 = vsyncadd [#allocation3], 4294967168 }
  0x1d   :  { %34 = sfence }
  0x1e   :  { %s438_s30 = sld [smem:[#allocation2 + $0x32]]  ;;  %s440_s3 = sld [smem:[#allocation2 + $0x33]]  ;;  %v450_v0 = vld [vmem:[#allocation6] sm:$0xff]  ;;  %vm263_vm0 = vcmask 1043456  }
  0x1f   :  { %s40_s4 = sld [smem:[#allocation2]]  ;;  %s284_s5 = sld [smem:[#allocation2 + $0x1]] }
  0x20   :  { %s442_s6 = sld [smem:[#allocation2 + $0x14]]  ;;  %s444_s7 = sld [smem:[#allocation2 + $0x1e]] }
  0x21   :  { %s446_s8 = sld [smem:[#allocation2 + $0x28]]  ;;  %s288_s9 = sld [smem:[#allocation2 + $0x2]] }
  0x22   :  { %s289_s1 = sld [smem:[#allocation2 + $0x3]]  ;;  %s448_s10 = sld [smem:[#allocation2 + $0x15]] }
  0x23   :  { %s452_s11 = sld [smem:[#allocation2 + $0x1f]]  ;;  %s454_s12 = sld [smem:[#allocation2 + $0x29]] }
  0x24   :  { %s456_s13 = sld [smem:[#allocation2 + $0x4]]  ;;  %s458_s14 = sld [smem:[#allocation2 + $0x5]]  ;;  %v37_v5 = vstv %s438_s30  ;;  %v39_v7 = vstv %s440_s3 }
  0x25   :  { %v41_v1 = vstv %s40_s4  ;;  %v44_v2 = vstv %s284_s5  ;;  %s460_s15 = sld [smem:[#allocation2 + $0x16]]  ;;  %s462_s16 = sld [smem:[#allocation2 + $0x20]] }
  0x26   :  { %v42_v3 = vmul.f32 %v41_v1, %v450_v0  ;;  %v45_v4 = vmul.f32 %v44_v2, %v450_v0  ;;  %s466_s17 = sld [smem:[#allocation2 + $0x2a]]  ;;  %s468_s18 = sld [smem:[#allocation2 + $0x6]]  ;;  %v51_v9 = vstv %s442_s6  ;;  %v55_v11 = vstv %s444_s7 }
  0x27   :  { %v63_v6 = vstv %s288_s9  ;;  %s471_s19 = sld [smem:[#allocation2 + $0x7]]  ;;  %s477_s21 = sld [smem:[#allocation2 + $0x21]]  ;;  %v59_v12 = vstv %s446_s8 }
  0x28   :  { %s473_s20 = sld [smem:[#allocation2 + $0x17]]  ;;  %v47_v8 = vrot.slane %v45_v4, 4  ;;  %v66_v10 = vstv %s289_s1  ;;  %v64_v13 = vmul.f32 %v63_v6, %v450_v0  ;;  %s483_s22 = sld [smem:[#allocation2 + $0x8]]  ;;  %v73_v16 = vstv %s448_s10 }
  0x29   :  { %v67_v14 = vmul.f32 %v66_v10, %v450_v0  ;;  %s485_s23 = sld [smem:[#allocation2 + $0x9]]  ;;  %v77_v20 = vstv %s452_s11  ;;  %s493_s24 = sld [smem:[#allocation2 + $0x2b]]  ;;  %v81_v24 = vstv %s454_s12 }
  0x2a   :  { %v49_v15 = vadd.f32 %v47_v8, %v42_v3  ;;  %v85_v17 = vstv %s456_s13  ;;  %v88_v18 = vstv %s458_s14  ;;  %s498_s25 = sld [smem:[#allocation2 + $0x18]]  ;;  %s500_s26 = sld [smem:[#allocation2 + $0xa]] }
  0x2b   :  { %v69_v19 = vrot.slane %v67_v14, 4  ;;  %v86_v21 = vmul.f32 %v85_v17, %v450_v0  ;;  %v89_v22 = vmul.f32 %v88_v18, %v450_v0  ;;  %v95_v25 = vstv %s460_s15  ;;  %s507_s27 = sld [smem:[#allocation2 + $0xb]]  ;;  %s512_s28 = sld [smem:[#allocation2 + $0x22]] }
  0x2c   :  { %v52_v23 = vadd.f32 %v51_v9, %v49_v15  ;;  %v107_v26 = vstv %s468_s18  ;;  %v99_v29 = vstv %s462_s16  ;;  %v103_v32 = vstv %s466_s17  ;;  %s514_s0 = sld [smem:[#allocation2 + $0x2c]]  ;;  %s520_s30 = sld [smem:[#allocation2 + $0xd]] }
  0x2d   :  { %v71_v27 = vadd.f32 %v69_v19, %v64_v13  ;;  %v91_v28 = vrot.slane %v89_v22, 4  ;;  %v110_v30 = vstv %s471_s19  ;;  %v108_v33 = vmul.f32 %v107_v26, %v450_v0  ;;  %s518_s29 = sld [smem:[#allocation2 + $0xc]]  ;;  %s523_s3 = sld [smem:[#allocation2 + $0x19]] }
  0x2e   :  { %v53_v31 = vmax.f32 %v52_v23, 0.0  ;;  %v111_v34 = vmul.f32 %v110_v30, %v450_v0  ;;  %v117_v37 = vstv %s473_s20  ;;  %v129_v38 = vstv %s483_s22  ;;  %s525_s4 = sld [smem:[#allocation2 + $0x23]]  ;;  %s530_s5 = sld [smem:[#allocation2 + $0x2d]] }
  0x2f   :  { %v74_v35 = vadd.f32 %v73_v16, %v71_v27  ;;  %v93_v36 = vadd.f32 %v91_v28, %v86_v21  ;;  %v121_v42 = vstv %s477_s21  ;;  %v130_v45 = vmul.f32 %v129_v38, %v450_v0  ;;  %s532_s6 = sld [smem:[#allocation2 + $0xe]]  ;;  %s534_s7 = sld [smem:[#allocation2 + $0x1a]] }
  0x30   :  { %v56_v39 = vmul.f32 %v55_v11, %v53_v31  ;;  %v60_v40 = vmul.f32 %v59_v12, %v53_v31  ;;  %v113_v41 = vrot.slane %v111_v34, 4  ;;  %v132_v46 = vstv %s485_s23  ;;  %s536_s8 = sld [smem:[#allocation2 + $0xf]]  ;;  %s539_s9 = sld [smem:[#allocation2 + $0x24]] }
  0x31   :  { %v75_v43 = vmax.f32 %v74_v35, 0.0  ;;  %v96_v44 = vadd.f32 %v95_v25, %v93_v36  ;;  %v133_v50 = vmul.f32 %v132_v46, %v450_v0  ;;  %v125_v54 = vstv %s493_s24  ;;  %s541_s1 = sld [smem:[#allocation2 + $0x2e]]  ;;  %s545_s10 = sld [smem:[#allocation2 + $0x1b]] }
  0x32   :  { %v57_v47 = vadd.f32 %v56_v39, %v37_v5  ;;  %v61_v48 = vadd.f32 %v60_v40, %v39_v7  ;;  %v115_v49 = vadd.f32 %v113_v41, %v108_v33  ;;  %v139_v57 = vstv %s498_s25  ;;  %s548_s11 = sld [smem:[#allocation2 + $0x10]]  ;;  %s550_s12 = sld [smem:[#allocation2 + $0x11]] }
  0x33   :  { %v78_v51 = vmul.f32 %v77_v20, %v75_v43  ;;  %v82_v52 = vmul.f32 %v81_v24, %v75_v43  ;;  %v97_v53 = vmax.f32 %v96_v44, 0.0  ;;  %v135_v56 = vrot.slane %v133_v50, 4  ;;  %s555_s13 = sld [smem:[#allocation2 + $0x25]]  ;;  %s559_s14 = sld [smem:[#allocation2 + $0x2f]] }
  0x34   :  { %v118_v55 = vadd.f32 %v117_v37, %v115_v49  ;;  %v151_v58 = vstv %s500_s26  ;;  %v154_v2 = vstv %s507_s27  ;;  %v143_v10 = vstv %s512_s28  ;;  %s563_s15 = sld [smem:[#allocation2 + $0x12]]  ;;  %s567_s16 = sld [smem:[#allocation2 + $0x1c]] }
  0x35   :  { %v79_v59 = vadd.f32 %v78_v51, %v57_v47  ;;  %v83_v60 = vadd.f32 %v82_v52, %v61_v48  ;;  %v100_v61 = vmul.f32 %v99_v29, %v97_v53  ;;  %v104_v62 = vmul.f32 %v103_v32, %v97_v53  ;;  %s569_s17 = sld [smem:[#allocation2 + $0x13]]  ;;  %s580_s18 = sld [smem:[#allocation2 + $0x1d]] }
  0x36   :  { %v119_v63 = vmax.f32 %v118_v55, 0.0  ;;  %v137_v1 = vadd.f32 %v135_v56, %v130_v45  ;;  %v152_v5 = vmul.f32 %v151_v58, %v450_v0  ;;  %v155_v6 = vmul.f32 %v154_v2, %v450_v0  ;;  %s583_s19 = sld [smem:[#allocation2 + $0x26]]  ;;  %s585_s20 = sld [smem:[#allocation2 + $0x30]] }
  0x37   :  { %v101_v3 = vadd.f32 %v100_v61, %v79_v59  ;;  %v105_v4 = vadd.f32 %v104_v62, %v83_v60  ;;  %v147_v11 = vstv %s514_s0  ;;  %v173_v13 = vstv %s518_s29  ;;  %s331_s21 = sld [smem:[#allocation2 + $0x27]]  ;;  %s332_s22 = sld [smem:[#allocation2 + $0x31]] }
  0x38   :  { %v122_v7 = vmul.f32 %v121_v42, %v119_v63  ;;  %v126_v8 = vmul.f32 %v125_v54, %v119_v63  ;;  %v140_v9 = vadd.f32 %v139_v57, %v137_v1  ;;  %v157_v12 = vrot.slane %v155_v6, 4  ;;  %s398_s23 = smov [#allocation7]  }
  0x39   :  { %v176_v14 = vstv %s520_s30  ;;  %v161_v17 = vstv %s523_s3  ;;  %v165_v18 = vstv %s525_s4  ;;  %v174_v21 = vmul.f32 %v173_v13, %v450_v0  ;;  %s272_s24 = sshll.u32 %s398_s23, 4  ;;  %s273_s24 = int_to_ptr.vmem [resolvable:$true] %s272_s24 }
  0x3a   :  { %v123_v15 = vadd.f32 %v122_v7, %v101_v3  ;;  %v141_v16 = vmax.f32 %v140_v9, 0.0  ;;  %v127_v19 = vadd.f32 %v126_v8, %v105_v4  ;;  %v159_v20 = vadd.f32 %v157_v12, %v152_v5  ;;  %s368_s25 = scalar_lea.vmem %s273_s24, 128  ;;  %p373_p12 = scmp.lt.s32.totalorder %s273_s24, %s273_s24 }
  0x3b   :  { %v177_v22 = vmul.f32 %v176_v14, %v450_v0  ;;  %v169_v25 = vstv %s530_s5  ;;  %v195_v26 = vstv %s532_s6  ;;  %v183_v29 = vstv %s534_s7  ;;  %p369_p11 = scmp.ne.s32.totalorder %s273_s24, %s368_s25  ;;  %p374_p13 = scmp.lt.s32.totalorder %s368_s25, %s368_s25 }
  0x3c   :  { %v144_v23 = vmul.f32 %v143_v10, %v141_v16  ;;  %v148_v24 = vmul.f32 %v147_v11, %v141_v16  ;;  %v162_v27 = vadd.f32 %v161_v17, %v159_v20  ;;  %v198_v30 = vstv %s536_s8 }
  0x3d   :  { %v179_v28 = vrot.slane %v177_v22, 4  ;;  %v187_v31 = vstv %s539_s9  ;;  %v191_v32 = vstv %s541_s1  ;;  %v196_v33 = vmul.f32 %v195_v26, %v450_v0  ;;  %p375_p0 = por %p374_p13, %p373_p12 }
  0x3e   :  { %v199_v34 = vmul.f32 %v198_v30, %v450_v0  ;;  %v145_v35 = vadd.f32 %v144_v23, %v123_v15  ;;  %v149_v36 = vadd.f32 %v148_v24, %v127_v19  ;;  %v163_v37 = vmax.f32 %v162_v27, 0.0 }
  0x3f   :  { %v181_v38 = vadd.f32 %v179_v28, %v174_v21  ;;  %v205_v40 = vstv %s545_s10  ;;  %v217_v41 = vstv %s548_s11  ;;  %v220_v42 = vstv %s550_s12  ;;  %p376_p1 = pnand %p375_p0, %p369_p11 }
  0x40   :  { %v201_v39 = vrot.slane %v199_v34, 4  ;;  %v166_v43 = vmul.f32 %v165_v18, %v163_v37  ;;  %v170_v44 = vmul.f32 %v169_v25, %v163_v37  ;;  %v209_v46 = vstv %s555_s13 }
  0x41   :  { %v184_v45 = vadd.f32 %v183_v29, %v181_v38  ;;  %v213_v48 = vstv %s559_s14  ;;  %v218_v49 = vmul.f32 %v217_v41, %v450_v0  ;;  %v221_v50 = vmul.f32 %v220_v42, %v450_v0 }
  0x42   :  { %v203_v47 = vadd.f32 %v201_v39, %v196_v33  ;;  %v167_v51 = vadd.f32 %v166_v43, %v145_v35  ;;  %v171_v52 = vadd.f32 %v170_v44, %v149_v36  ;;  %v239_v54 = vstv %s563_s15 }
  0x43   :  { %v185_v53 = vmax.f32 %v184_v45, 0.0  ;;  %v223_v56 = vrot.slane %v221_v50, 4  ;;  %v227_v57 = vstv %s567_s16  ;;  %v242_v58 = vstv %s569_s17 }
  0x44   :  { %v206_v55 = vadd.f32 %v205_v40, %v203_v47  ;;  %v240_v61 = vmul.f32 %v239_v54, %v450_v0  ;;  %v243_v62 = vmul.f32 %v242_v58, %v450_v0  ;;  %v249_v8 = vstv %s580_s18 }
  0x45   :  { %v188_v59 = vmul.f32 %v187_v31, %v185_v53  ;;  %v192_v60 = vmul.f32 %v191_v32, %v185_v53  ;;  %v225_v1 = vadd.f32 %v223_v56, %v218_v49  ;;  %v231_v9 = vstv %s583_s19 }
  0x46   :  { %v207_v63 = vmax.f32 %v206_v55, 0.0  ;;  %v245_v4 = vrot.slane %v243_v62, 4  ;;  %v235_v10 = vstv %s585_s20  ;;  %v253_v18 = vstv %s331_s21 }
  0x47   :  { %v189_v2 = vadd.f32 %v188_v59, %v167_v51  ;;  %v193_v3 = vadd.f32 %v192_v60, %v171_v52  ;;  %v228_v7 = vadd.f32 %v227_v57, %v225_v1  ;;  %v257_v0 = vstv %s332_s22 }
  0x48   :  { %v210_v5 = vmul.f32 %v209_v46, %v207_v63  ;;  %v214_v6 = vmul.f32 %v213_v48, %v207_v63  ;;  %v247_v11 = vadd.f32 %v245_v4, %v240_v61 }
  0x49   :  { %v229_v14 = vmax.f32 %v228_v7, 0.0 }
  0x4a   :  { %v211_v12 = vadd.f32 %v210_v5, %v189_v2  ;;  %v215_v13 = vadd.f32 %v214_v6, %v193_v3  ;;  %v250_v15 = vadd.f32 %v249_v8, %v247_v11 }
  0x4b   :  { %v232_v16 = vmul.f32 %v231_v9, %v229_v14  ;;  %v236_v17 = vmul.f32 %v235_v10, %v229_v14 }
  0x4c   :  { %v251_v19 = vmax.f32 %v250_v15, 0.0 }
  0x4d   :  { %v233_v20 = vadd.f32 %v232_v16, %v211_v12  ;;  %v237_v21 = vadd.f32 %v236_v17, %v215_v13 }
  0x4e   :  { %v254_v22 = vmul.f32 %v253_v18, %v251_v19  ;;  %v258_v23 = vmul.f32 %v257_v0, %v251_v19 }
  0x50   :  { %v255_v24 = vadd.f32 %v254_v22, %v233_v20  ;;  %v259_v25 = vadd.f32 %v258_v23, %v237_v21 }
  0x52   :  { %v261_v26 = vrot.slane %v259_v25, 4 }
  0x54   :  { %v264_v27 = vsel %vm263_vm0, %v255_v24, %v261_v26 }
  0x55   :  { %265 = vst [vmem:[#allocation7] sm:$0xff] %v264_v27 }
  0x56   :  { %379 = shalt.err (!%p376_p1)
}
  0x57   :  { %s380_s28 = scalar_lea.hbm %s612_s2, 128 }
  0x58   :  { %p381_p2 = scmp.ne.s32.totalorder %s612_s2, %s380_s28  ;;  %p384_p3 = scmp.lt.u32.totalorder %s380_s28, %s612_s2 }
  0x5a   :  { %p386_p4 = pnand %p384_p3, %p381_p2 }
  0x5c   :  { %389 = shalt.err (!%p386_p4)
}
  0x5d   :  { %275 = dma.vmem_to_hbm [thread:$0]  %s273_s24, 128, %s612_s2, [#allocation4]  }
  0x5e   :  { %394 = dma.done.wait [#allocation4], 128  }
  0x5f   :  { %395 = vsyncadd [#allocation4], 4294967168 }
  0x60   :  { %279 = vsyncpa [#allocation3], 1 }
  0x61   :  { %280 = vsyncpa [#allocation4], 1 }
  0x62   :  { %281 = vsyncpa [#allocation5], 1 }

</bundles_post_ra>
